<compile_context>
chip_gen: v5e
topology: v5e:2x2
jax: 0.10.0
libtpu: 0.0.40
codegen_flags: <defaults>
</compile_context>

<pallas_src>
import functools

import jax
import jax.numpy as jnp
from jax.experimental import pallas as pl
from jax.experimental.pallas import tpu as pltpu

N_CLUSTERS = 5
HIDDEN = 10
ALPHA = 1.0


def _clustering_kernel(x_ref, ct_ref, o_ref, *, alpha):
    # x_ref: (tile_n, hidden), ct_ref: (hidden, n_clusters), o_ref: (tile_n, n_clusters)
    x = x_ref[...]        # native dtype (bf16 or f32) -> MXU accumulates in f32
    c_t = ct_ref[...]

    # ||x - c||^2 = ||x||^2 + ||c||^2 - 2 x.c   (cross term on the MXU)
    xf = x.astype(jnp.float32)
    x_sq = jnp.sum(xf * xf, axis=-1, keepdims=True)                 # (tile_n, 1)
    cf = c_t.astype(jnp.float32)
    c_sq = jnp.sum(cf * cf, axis=0, keepdims=True)                  # (1, n_clusters)
    cross = jnp.dot(x, c_t, preferred_element_type=jnp.float32)     # (tile_n, n_clusters)

    norm_sq = jnp.maximum(x_sq + c_sq - 2.0 * cross, 0.0)

    # alpha is a static Python float: fold the /alpha and the pow at trace time.
    if alpha == 1.0:
        numerator = 1.0 / (1.0 + norm_sq)
    else:
        numerator = 1.0 / (1.0 + norm_sq * (1.0 / alpha))
        power = (alpha + 1.0) / 2.0
        if power != 1.0:
            numerator = numerator ** power

    denom = jnp.sum(numerator, axis=-1, keepdims=True)              # (tile_n, 1)
    # EUP approximate reciprocal + one Newton refinement (keeps ~1e-7 rel error).
    r = pl.reciprocal(denom, approx=True)
    r = r * (2.0 - denom * r)
    o_ref[...] = (numerator * r).astype(o_ref.dtype)


def clustering_layer(x, cluster_centers, alpha=ALPHA, tile_n=2048):
    """Pallas-backed DEC ClusteringLayer forward. x: (N, hidden) -> (N, n_clusters)."""
    n, hidden = x.shape
    n_clusters, hidden_c = cluster_centers.shape
    assert hidden == hidden_c

    # Fixed row tile (multiple of 8), capped so tiny batches aren't over-padded.
    tile_n = max(8, min(int(tile_n), int(pl.next_power_of_2(max(n, 1)))))
    tile_n = ((tile_n + 7) // 8) * 8

    n_pad = pl.cdiv(n, tile_n) * tile_n
    if n_pad != n:
        x = jnp.pad(x, ((0, n_pad - n), (0, 0)))

    # Hoist the transpose out of the kernel: centers as (hidden, n_clusters).
    c_t = jnp.asarray(cluster_centers).T

    kernel = functools.partial(_clustering_kernel, alpha=float(alpha))

    out = pl.pallas_call(
        kernel,
        out_shape=jax.ShapeDtypeStruct((n_pad, n_clusters), jnp.float32),
        grid_spec=pltpu.PrefetchScalarGridSpec(
            num_scalar_prefetch=0,
            grid=(n_pad // tile_n,),
            in_specs=[
                pl.BlockSpec((tile_n, hidden), lambda i: (i, 0)),
                # constant index_map: centers stay resident, no per-step re-DMA
                pl.BlockSpec((hidden, n_clusters), lambda i: (0, 0)),
            ],
            out_specs=pl.BlockSpec((tile_n, n_clusters), lambda i: (i, 0)),
        ),
        compiler_params=pltpu.CompilerParams(
            dimension_semantics=("parallel",)),
    )(x, c_t)

    if n_pad != n:
        out = out[:n]
    return out


def _xavier_uniform(key, shape, dtype=jnp.float32):
    fan_in, fan_out = shape[1], shape[0]
    bound = (6.0 / (fan_in + fan_out)) ** 0.5
    return jax.random.uniform(key, shape, dtype, minval=-bound, maxval=bound)


def _reference(x, c, alpha=ALPHA):
    norm_sq = jnp.sum((x[:, None, :] - c[None, :, :]) ** 2, axis=2)
    num = 1.0 / (1.0 + norm_sq / alpha)
    num = num ** ((alpha + 1.0) / 2.0)
    return num / jnp.sum(num, axis=1, keepdims=True)


if __name__ == "__main__":
    key = jax.random.PRNGKey(0)
    k_x, k_c = jax.random.split(key)

    batch = 8
    x = jax.random.normal(k_x, (batch, HIDDEN), dtype=jnp.float32)
    # deterministic xavier-uniform init of the cluster-center parameter
    cluster_centers = _xavier_uniform(k_c, (N_CLUSTERS, HIDDEN))

    t_dist = clustering_layer(x, cluster_centers)
    t_dist = jax.block_until_ready(t_dist)

    ref = _reference(x, cluster_centers)
    assert t_dist.shape == (batch, N_CLUSTERS)
    assert jnp.allclose(t_dist, ref, atol=1e-5, rtol=1e-5)
    assert jnp.allclose(jnp.sum(t_dist, axis=1), 1.0, atol=1e-5)

    # also exercise the multi-tile / padded path once
    big_n = 5000
    xb = jax.random.normal(k_x, (big_n, HIDDEN), dtype=jnp.float32)
    tb = jax.block_until_ready(clustering_layer(xb, cluster_centers, tile_n=1024))
    assert tb.shape == (big_n, N_CLUSTERS)
    assert jnp.allclose(tb, _reference(xb, cluster_centers), atol=1e-5, rtol=1e-5)

    print("KERNEL_OK")
</pallas_src>

<mosaic_0001>
module attributes {stable_mosaic.version = 11 : i64} {
  func.func @_clustering_kernel(%arg0: i32, %arg1: memref<8x10xf32, #tpu.memory_space<vmem>>, %arg2: memref<10x5xf32, #tpu.memory_space<vmem>>, %arg3: memref<8x5xf32, #tpu.memory_space<vmem>>) attributes {dimension_semantics = [#tpu.dimension_semantics<parallel>], iteration_bounds = array<i64: 1>, scalar_prefetch = 0 : i64, scratch_operands = 0 : i64, tpu.core_type = #tpu.core_type<tc>, window_params = [{transform_indices = @transform_0, window_bounds = array<i64: 8, 10>}, {pipeline_mode = #tpu.pipeline_mode<synchronous>, transform_indices = @transform_1, window_bounds = array<i64: 10, 5>}, {transform_indices = @transform_2, window_bounds = array<i64: 8, 5>}]} {
    %c0 = arith.constant 0 : index
    %c0_0 = arith.constant 0 : index
    %0 = vector.load %arg1[%c0, %c0_0] : memref<8x10xf32, #tpu.memory_space<vmem>>, vector<8x10xf32>
    %c0_1 = arith.constant 0 : index
    %c0_2 = arith.constant 0 : index
    %1 = vector.load %arg2[%c0_1, %c0_2] : memref<10x5xf32, #tpu.memory_space<vmem>>, vector<10x5xf32>
    %2 = arith.mulf %0, %0 : vector<8x10xf32>
    %cst = arith.constant dense<0.000000e+00> : vector<8xf32>
    %3 = vector.multi_reduction <add>, %2, %cst [1] : vector<8x10xf32> to vector<8xf32>
    %4 = vector.shape_cast %3 : vector<8xf32> to vector<8x1xf32>
    %5 = arith.mulf %1, %1 : vector<10x5xf32>
    %cst_3 = arith.constant dense<0.000000e+00> : vector<5xf32>
    %6 = vector.multi_reduction <add>, %5, %cst_3 [0] : vector<10x5xf32> to vector<5xf32>
    %7 = vector.shape_cast %6 : vector<5xf32> to vector<1x5xf32>
    %cst_4 = arith.constant dense<0.000000e+00> : vector<8x5xf32>
    %8 = tpu.matmul %0, %1, %cst_4 {dimension_numbers = #tpu.dot_dimension_numbers<[1], [0], [0], [1], [0, 0, 1, 1], [], []>} : vector<8x10xf32>, vector<10x5xf32>, vector<8x5xf32> -> vector<8x5xf32>
    %9 = vector.broadcast %4 : vector<8x1xf32> to vector<8x5xf32>
    %10 = vector.broadcast %7 : vector<1x5xf32> to vector<8x5xf32>
    %11 = arith.addf %9, %10 : vector<8x5xf32>
    %cst_5 = arith.constant 2.000000e+00 : f32
    %12 = vector.broadcast %cst_5 : f32 to vector<8x5xf32>
    %13 = arith.mulf %12, %8 : vector<8x5xf32>
    %14 = arith.subf %11, %13 : vector<8x5xf32>
    %cst_6 = arith.constant 0.000000e+00 : f32
    %15 = vector.broadcast %cst_6 : f32 to vector<8x5xf32>
    %16 = arith.maximumf %14, %15 : vector<8x5xf32>
    %cst_7 = arith.constant 1.000000e+00 : f32
    %17 = vector.broadcast %cst_7 : f32 to vector<8x5xf32>
    %18 = arith.addf %17, %16 : vector<8x5xf32>
    %cst_8 = arith.constant 1.000000e+00 : f32
    %19 = vector.broadcast %cst_8 : f32 to vector<8x5xf32>
    %20 = arith.divf %19, %18 : vector<8x5xf32>
    %cst_9 = arith.constant dense<0.000000e+00> : vector<8xf32>
    %21 = vector.multi_reduction <add>, %20, %cst_9 [1] : vector<8x5xf32> to vector<8xf32>
    %22 = vector.shape_cast %21 : vector<8xf32> to vector<8x1xf32>
    %23 = tpu.reciprocal %22 {approx = true} : vector<8x1xf32> -> vector<8x1xf32>
    %24 = arith.mulf %22, %23 : vector<8x1xf32>
    %cst_10 = arith.constant 2.000000e+00 : f32
    %25 = vector.broadcast %cst_10 : f32 to vector<8x1xf32>
    %26 = arith.subf %25, %24 : vector<8x1xf32>
    %27 = arith.mulf %23, %26 : vector<8x1xf32>
    %28 = vector.broadcast %27 : vector<8x1xf32> to vector<8x5xf32>
    %29 = arith.mulf %20, %28 : vector<8x5xf32>
    %c0_11 = arith.constant 0 : index
    %c0_12 = arith.constant 0 : index
    %30 = vector.load %arg3[%c0_11, %c0_12] : memref<8x5xf32, #tpu.memory_space<vmem>>, vector<8x5xf32>
    tpu.vector_store %arg3[%c0_11, %c0_12], %29 {strides = array<i32>} : memref<8x5xf32, #tpu.memory_space<vmem>>, vector<8x5xf32>,
    return
  }
  func.func @transform_0(%arg0: i32) -> (i32, i32) {
    %c0_i32 = arith.constant 0 : i32
    %c0_i32_0 = arith.constant 0 : i32
    return %arg0, %c0_i32 : i32, i32
  }
  func.func @transform_1(%arg0: i32) -> (i32, i32) {
    %c0_i32 = arith.constant 0 : i32
    %c0_i32_0 = arith.constant 0 : i32
    %c0_i32_1 = arith.constant 0 : i32
    return %c0_i32, %c0_i32_0 : i32, i32
  }
  func.func @transform_2(%arg0: i32) -> (i32, i32) {
    %c0_i32 = arith.constant 0 : i32
    %c0_i32_0 = arith.constant 0 : i32
    return %arg0, %c0_i32 : i32, i32
  }
}

</mosaic_0001>

<bundles_post_ra>
// kernel: tpu_custom_call.1
= control target key start
LH: loop header
LB: loop body
LE: loop exit
PB: predicated region body
PF: predicated region fallthrough
CT: control target
= control target key end

     0   :  { %vm36_vm0 = vcmask 1041408   ;;  %vm16_vm1 = vcmask 80896   ;;  %s169_s0 = inlined_call_operand.vmem [shape: f32[8,10], index: 0, kind: input, shape index: {}]   ;;  %s170_s1 = inlined_call_operand.vmem [shape: f32[10,5], index: 1, kind: input, shape index: {}]   ;;  %s171_s2 = inlined_call_operand.hbm [shape: f32[8,5], index: 2, kind: output, shape index: {}]  }
   0x1   :  { %v14_v0 = vld [vmem:[%s170_s1 + $0x8] sm:$0x3]  ;;  %v13_v1 = vld [vmem:[%s170_s1] sm:$0xff] }
   0x2   :  { %v12_v2 = vld [vmem:[%s169_s0] sm:$0xff]  ;;  %105 = vmatpush.msk.msra.mxu0 %vm36_vm0, %v14_v0 }
   0x3   :  { %v15_v3 = vmul.f32 %v12_v2, %v12_v2 }
   0x4   :  { %7 = vsyncpa [#allocation3], 0  ;;  %55 = vmatpush.msra.mxu0 %v13_v1  ;;  %v21_v5 = vmul.f32 %v14_v0, %v14_v0  ;;  %vm24_vm2 = vcmask 33792   ;;  %v20_v6 = vmul.f32 %v13_v1, %v13_v1  ;;  %vm22_vm3 = vcmask 39936   ;;  %s138_s0 = smov [#allocation2]   ;;  %s96_s17 = sshll.u32 %s171_s2, 4  ;;  %s97_s17 = int_to_ptr.hbm [resolvable:$true] %s96_s17 }
   0x5   :  { %v17_v4 = vsel %vm16_vm1, %v15_v3, 0.0  ;;  %106 = vmatmul.msk.f32.vlgmr.msra.gmra.mxu0 %vm16_vm1, %v12_v2  ;;  %s94_s1 = sshll.u32 %s138_s0, 4  ;;  %s95_s1 = int_to_ptr.vmem [resolvable:$true] %s94_s1 }
   0x6   :  { %18 = vadd.xlane.f32.xlu0 %v17_v4  ;;  %v25_v7 = vsel %vm24_vm2, %v21_v5, 0.0  ;;  %v23_v8 = vsel %vm22_vm3, %v20_v6, 0.0 }
   0x7   :  { %v26_v9 = vadd.f32 %v25_v7, %v23_v8 }
   0x9   :  { %v27_v10 = vrot.slane %v26_v9, 4 }
   0xb   :  { %v28_v11 = vadd.f32 %v27_v10, %v26_v9 }
   0xd   :  { %v29_v12 = vrot.slane %v28_v11, 2 }
   0xf   :  { %v30_v13 = vadd.f32 %v29_v12, %v28_v11 }
  0x11   :  { %v31_v14 = vrot.slane %v30_v13, 1 }
  0x13   :  { %v32_v15 = vadd.f32 %v31_v14, %v30_v13 }
  0x79   :  { %v19_v16 = vpop.xlane.xlu0 %18 }
  0x7a   :  { %v60_v17 = vadd.f32 %v32_v15, %v19_v16 }
  0x82   :  { %v57_v18 = vpop.f32.mrf.mxu0 }
  0x83   :  { %v61_v19 = vmul.f32 2.0, %v57_v18 }
  0x85   :  { %v62_v20 = vsub.f32 %v60_v17, %v61_v19 }
  0x87   :  { %v63_v21 = vmax.f32 %v62_v20, 0.0 }
  0x89   :  { %v64_v22 = vadd.f32 1.0, %v63_v21 }
  0x8b   :  { %108 = vrcp.f32 %v64_v22  ;;  %v76_v26 = vand.u32 2147483648, %v64_v22  ;;  %v74_v28 = vand.u32 2147483647, %v64_v22  ;;  %vm70_vm5 = vweird.f32 %v64_v22 }
  0x8d   :  { %v77_v30 = vor.u32 1.1754944e-38, %v76_v26  ;;  %vm75_vm7 = vcmp.eq.f32.partialorder %v74_v28, 8.507059e+37 }
  0x91   :  { %v109_v23 = vpop.eup %108 }
  0x92   :  { %v66_v24 = vmul.f32 %v109_v23, %v64_v22  ;;  %vm71_vm4 = vweird.f32 %v109_v23 }
  0x93   :  { %vm72_vm6 = vmor %vm70_vm5, %vm71_vm4 }
  0x94   :  { %v67_v25 = vsub.f32 1.0, %v66_v24 }
  0x96   :  { %v68_v27 = vmul.f32 %v109_v23, %v67_v25 }
  0x98   :  { %v69_v29 = vadd.f32 %v109_v23, %v68_v27 }
  0x9a   :  { %v73_v31 = vsel %vm72_vm6, %v109_v23, %v69_v29 }
  0x9b   :  { %v78_v32 = vsel %vm75_vm7, %v77_v30, %v73_v31 }
  0x9c   :  { %v80_v33 = vsel %vm22_vm3, %v78_v32, 0.0 }
  0x9d   :  { %81 = vadd.xlane.f32.xlu0 %v80_v33 }
 0x110   :  { %v82_v34 = vpop.xlane.xlu0 %81 }
 0x111   :  { %110 = vrcp.f32 %v82_v34 }
 0x117   :  { %v111_v35 = vpop.eup %110 }
 0x118   :  { %v84_v36 = vmul.f32 %v111_v35, %v82_v34 }
 0x11a   :  { %v85_v37 = vsub.f32 2.0, %v84_v36 }
 0x11c   :  { %v86_v38 = vmul.f32 %v111_v35, %v85_v37 }
 0x11e   :  { %v87_v39 = vmul.f32 %v86_v38, %v78_v32 }
 0x120   :  { %88 = vst.msk [vmem:[#allocation2] sm:$0xff] %vm22_vm3, %v87_v39 }
 0x121   :  { %99 = dma.vmem_to_hbm [thread:$0]  %s95_s1, 128, %s97_s17, [#allocation3]  }
 0x122   :  { %136 = dma.done.wait [#allocation3], 128  }
 0x123   :  { %137 = vsyncadd [#allocation3], 4294967168 }
 0x124   :  { %104 = vsyncpa [#allocation3], 1 }

</bundles_post_ra>
